<compile_context>
chip_gen: v7x
topology: tpu7x:2x2x1
jax: 0.10.0
libtpu: 0.0.40
codegen_flags: <defaults>
</compile_context>

<pallas_src>
import jax
import jax.numpy as jnp
from jax import lax
from jax.experimental import pallas as pl
from jax.experimental.pallas import tpu as pltpu

# ---- UCPairwiseLoss default hyper-parameters -------------------------------
MARGIN = 0.0
LM, UM = 0.05, 0.25          # lower / upper margin
LA, UA = 10.0, 110.0         # lower / upper norm anchors
LAMBDA_G = 1.0
K = 3.0                      # reg_type = 'exp_3'
S = 30.0                     # logit scale
UG = 2.7183 ** (-K)          # module uses literal 2.7183 (not math.e); kept as-is


def _asin_sqrt(half):
    """arcsin(sqrt(half)) for half in [0, 1] (Cephes-style f32 polynomial).

    Takes the *square* so the small-angle branch reuses `half` directly instead
    of recomputing t*t (review item). jnp.arcsin has no guaranteed Mosaic
    lowering; this poly is ~1 ulp in f32.
    """
    t = jnp.sqrt(half)
    big = half > 0.25                       # == (t > 0.5)
    z = jnp.where(big, (1.0 - t) * 0.5, half)
    x = jnp.where(big, jnp.sqrt(z), t)
    p = ((((4.2163199048e-2 * z + 2.4181311049e-2) * z + 4.5470025998e-2) * z
          + 7.4953002686e-2) * z + 1.6666752422e-1) * z * x + x
    return jnp.where(big, jnp.float32(jnp.pi / 2) - 2.0 * p, p)


def _softplus(x):
    # matches torch.nn.functional.softplus (beta=1) to f32 precision
    return jnp.where(x > 0.0, x + jnp.log1p(jnp.exp(-x)), jnp.log1p(jnp.exp(x)))


def _margin_of_norm(norms):
    x = (jnp.clip(norms, LA, UA) - LA) / (UA - LA)
    return (UM - LM) * x + LM


def _make_kernel(n_valid, n_pad, tq):
    """Kernel closure; n_valid/n_pad/tq are static Python ints."""
    pad_cols = n_valid < n_pad

    def kernel(featn_ref, labq_ref, labk_ref, ucq_ref, uck_ref, sp_ref):
        i = pl.program_id(0)
        row0 = pl.multiple_of(i * tq, tq)

        keys = featn_ref[...]                              # (N_pad, D) bf16, resident
        q = featn_ref[pl.ds(row0, tq), :]                  # (TQ, D) bf16, same rows

        # ---- cosine Gram on the MXU: bf16 operands, f32 accumulate (q @ keys.T)
        gram = lax.dot_general(
            q, keys, dimension_numbers=(((1,), (1,)), ((), ())),
            preferred_element_type=jnp.float32)            # (TQ, N_pad)

        # ---- force the diagonal exact (self-distance exactly 0):
        # one lane iota vs a broadcast (TQ,1) row-index column (review item).
        ci = lax.broadcasted_iota(jnp.int32, (tq, n_pad), 1)
        ri = lax.broadcasted_iota(jnp.int32, (tq, 1), 0) + row0
        gram = jnp.where(ci == ri, 1.0, gram)

        # unit-norm rows => dist^2 = 2 - 2*cos; fold S into the -2 constant.
        half = jnp.clip((1.0 - gram) * 0.5, 0.0, 1.0)
        sim_s = (-2.0 * S) * _asin_sqrt(half)              # == S * raw arc similarity

        # ---- fused mask / margin algebra (selects instead of float-mask muls)
        maskb = labq_ref[...] == labk_ref[...]             # (TQ, N_pad) bool
        ucsum_s = ucq_ref[...] + uck_ref[...]              # S*(uc_i + uc_j), (TQ, N_pad)

        sm = jnp.float32(-10.0 * S)
        pos = -(sim_s + ucsum_s)                           # S * s_pos on positive pairs
        if MARGIN != 0.0:                                  # Python-gated; default 0
            pos = pos + jnp.float32(S * MARGIN)

        if pad_cols:                                       # drop padded key columns
            colv = ci < n_valid
            maskb_p = jnp.logical_and(maskb, colv)
            neg_keep = jnp.logical_and(jnp.logical_not(maskb), colv)
        else:
            maskb_p = maskb
            neg_keep = jnp.logical_not(maskb)

        zp = jnp.where(maskb_p, pos, sm)                   # S * s_pos
        zn = jnp.where(neg_keep, sim_s - ucsum_s, sm)      # S * s_neg

        def row_lse(z):
            m = jnp.max(z, axis=-1, keepdims=True)
            return jnp.log(jnp.sum(jnp.exp(z - m), axis=-1, keepdims=True)) + m

        sp_ref[...] = _softplus(row_lse(zp) + row_lse(zn))  # (TQ, 1)

    return kernel


def _tile_and_pad(n, target=128):
    """Pick the row tile TQ and padded batch size N_pad.

    TQ is a multiple of 16 whenever dynamic row slicing happens (bf16 sublane
    packing); any batch with more than 16 rows gets >= 2 grid steps so the
    "parallel" axis can shard across both v7x TensorCores.
    """
    if n <= 16:
        tq = ((n + 7) // 8) * 8          # single tile, slice offset is always 0
        return tq, tq
    if n <= target:
        tq = ((-(-n // 2) + 15) // 16) * 16
        return tq, 2 * tq
    tq = max(16, (target // 16) * 16)    # 128 by default (v5e MXU-native)
    return tq, -(-n // tq) * tq


def uc_pairwise_loss(feat, label, *, row_tile_target=128):
    """Forward of UCPairwiseLoss: returns (loss + reg - stop_grad(reg), 0, 0)."""
    n, d = feat.shape
    feat32 = feat.astype(jnp.float32)
    label = label.astype(jnp.int32)

    # ---- host-side per-row precompute (O(N*D), executed once; review item 1)
    norms = jnp.sqrt(jnp.sum(feat32 * feat32, axis=-1, keepdims=True))     # (N, 1)
    featn = (feat32 / jnp.maximum(norms, 1e-12)).astype(jnp.bfloat16)      # (N, D) bf16
    uc_s = (S * _margin_of_norm(norms)).astype(jnp.float32)                # (N, 1), S folded
    # reg term ('exp_3'); note: torch g() does NOT clip norms for 'exp' — keep unclipped.
    nx = (norms[:, 0] - LA) / (UA - LA)
    reg = jnp.mean(jnp.exp(-nx * K) / K + UG * nx) / (1.0 - UG) * LAMBDA_G

    # ---- row tiling / padding ------------------------------------------------
    tq, n_pad = _tile_and_pad(n, row_tile_target)
    pad = n_pad - n
    if pad:
        featn = jnp.pad(featn, ((0, pad), (0, 0)))                 # zero rows
        uc_s = jnp.pad(uc_s, ((0, pad), (0, 0)))
        label_p = jnp.pad(label, (0, pad), constant_values=-1)
    else:
        label_p = label
    lab_col = label_p.reshape(n_pad, 1)
    lab_row = label_p.reshape(1, n_pad)
    uc_row = uc_s.reshape(1, n_pad)

    grid = (n_pad // tq,)
    kernel = _make_kernel(n, n_pad, tq)

    # Explicit VMEM budget only when the live set could exceed the default
    # scoped limit (v5e default 16 MiB, v6e/v7x 32 MiB); tiny shapes don't set it.
    est = (n_pad * d * 2            # resident bf16 keys (single-buffered)
           + 10 * tq * n_pad * 4    # ~live (TQ, N) f32 slabs / temporaries
           + 8 * n_pad * 4          # resident label / margin rows
           + 16 * tq * 4)           # small per-tile columns, double-buffered
    cp = {"dimension_semantics": ("parallel",)}   # v7x: shard row tiles over 2 TCs
    if est > 24 * 1024 * 1024:
        cp["vmem_limit_bytes"] = int(min(est * 3 // 2, 120 * 1024 * 1024))

    # Constant-index blocks: single buffer (no pointless double-buffer copy).
    resident = dict(pipeline_mode=pl.Buffered(buffer_count=1))

    sp = pl.pallas_call(
        kernel,
        grid=grid,
        in_specs=[
            pl.BlockSpec((n_pad, d), lambda i: (0, 0), **resident),   # bf16 keys, resident
            pl.BlockSpec((tq, 1), lambda i: (i, 0)),                  # query labels (column)
            pl.BlockSpec((1, n_pad), lambda i: (0, 0), **resident),   # key labels (row), resident
            pl.BlockSpec((tq, 1), lambda i: (i, 0)),                  # S*uc query column
            pl.BlockSpec((1, n_pad), lambda i: (0, 0), **resident),   # S*uc key row, resident
        ],
        out_specs=pl.BlockSpec((tq, 1), lambda i: (i, 0)),            # per-row softplus(lse_p+lse_n)
        out_shape=jax.ShapeDtypeStruct((n_pad, 1), jnp.float32),
        compiler_params=pltpu.CompilerParams(**cp),
    )(featn, lab_col, lab_row, uc_s, uc_row)

    # Tiny N-element epilogue (glue, not hot path); padded rows dropped.
    loss = jnp.mean(sp[:n, 0])
    return loss + reg - lax.stop_gradient(reg), 0, 0


# ---- plain-JAX references ---------------------------------------------------
def _reference_loss(feat, label):
    """Mirrors the PyTorch math in full f32 (cdist path)."""
    norms = jnp.linalg.norm(feat, axis=-1)
    fn = feat / jnp.maximum(norms, 1e-12)[:, None]
    uc = (UM - LM) * (jnp.clip(norms, LA, UA) - LA) / (UA - LA) + LM
    diff = fn[:, None, :] - fn[None, :, :]
    dist = jnp.sqrt(jnp.sum(diff * diff, axis=-1))
    sim = -(jnp.arcsin(dist / 2.0) * 2.0)
    maskf = (label[:, None] == label[None, :]).astype(jnp.float32)
    nm = 1.0 - maskf
    ucsum = uc[:, None] + uc[None, :]
    corr = -(maskf * (ucsum - MARGIN)) + nm * ucsum
    sim = sim - corr
    s_pos = -sim * maskf - 10.0 * nm
    s_neg = sim * nm - 10.0 * maskf
    lp = jax.scipy.special.logsumexp(s_pos * S, axis=-1)
    ln = jax.scipy.special.logsumexp(s_neg * S, axis=-1)
    return jnp.mean(jax.nn.softplus(lp + ln))


def _reference_loss_bf16gram(feat, label):
    """Same math with the Gram quantized to bf16 like the kernel (jnp.arcsin);
    isolates kernel correctness (tiling/padding/asin poly/fused algebra) from
    the expected bf16 MXU quantization."""
    n = feat.shape[0]
    norms = jnp.linalg.norm(feat, axis=-1)
    fn = feat / jnp.maximum(norms, 1e-12)[:, None]
    fnb = fn.astype(jnp.bfloat16)
    gram = jnp.dot(fnb, fnb.T, preferred_element_type=jnp.float32)
    gram = jnp.where(jnp.eye(n, dtype=bool), 1.0, gram)
    half = jnp.clip((1.0 - gram) * 0.5, 0.0, 1.0)
    sim = -2.0 * jnp.arcsin(jnp.sqrt(half))
    uc = (UM - LM) * (jnp.clip(norms, LA, UA) - LA) / (UA - LA) + LM
    maskf = (label[:, None] == label[None, :]).astype(jnp.float32)
    ucsum = uc[:, None] + uc[None, :]
    sim = sim - (ucsum * (1.0 - 2.0 * maskf) + MARGIN * maskf)
    s_pos = -sim * maskf - 10.0 * (1.0 - maskf)
    s_neg = sim * (1.0 - maskf) - 10.0 * maskf
    lp = jax.scipy.special.logsumexp(s_pos * S, axis=-1)
    ln = jax.scipy.special.logsumexp(s_neg * S, axis=-1)
    return jnp.mean(jax.nn.softplus(lp + ln))


if __name__ == "__main__":
    root = jax.random.PRNGKey(0)

    def check(n, d, tag):
        k1, k2, k3 = jax.random.split(jax.random.fold_in(root, tag), 3)
        dirs = jax.random.normal(k1, (n, d), dtype=jnp.float32)
        scales = jax.random.uniform(k2, (n, 1), minval=5.0, maxval=120.0,
                                    dtype=jnp.float32)
        feat = dirs / jnp.linalg.norm(dirs, axis=-1, keepdims=True) * scales
        label = jax.random.randint(k3, (n,), 0, 3, dtype=jnp.int32)

        out, _, _ = uc_pairwise_loss(feat, label)
        out = jax.block_until_ready(out)
        assert bool(jnp.isfinite(out)), "kernel produced non-finite loss"

        ref_q = _reference_loss_bf16gram(feat, label)   # same bf16 quantization -> tight
        ref_f = _reference_loss(feat, label)            # full-f32 PyTorch math -> loose
        assert abs(float(out) - float(ref_q)) < 3e-3, (n, float(out), float(ref_q))
        # bf16 Gram x S=30 amplification headroom for the full-precision reference
        assert abs(float(out) - float(ref_f)) < 1e-1, (n, float(out), float(ref_f))

    check(8, 128, 0)    # single row tile, no padding
    check(20, 128, 1)   # 2 grid steps + padded rows / masked padded key columns
    print("KERNEL_OK")
</pallas_src>

<mosaic_0001>
module attributes {stable_mosaic.version = 11 : i64} {
  func.func @kernel(%arg0: i32, %arg1: memref<8x128xbf16, #tpu.memory_space<vmem>>, %arg2: memref<8x1xi32, #tpu.memory_space<vmem>>, %arg3: memref<1x8xi32, #tpu.memory_space<vmem>>, %arg4: memref<8x1xf32, #tpu.memory_space<vmem>>, %arg5: memref<1x8xf32, #tpu.memory_space<vmem>>, %arg6: memref<8x1xf32, #tpu.memory_space<vmem>>) attributes {dimension_semantics = [#tpu.dimension_semantics<parallel>], iteration_bounds = array<i64: 1>, scalar_prefetch = 0 : i64, scratch_operands = 0 : i64, tpu.core_type = #tpu.core_type<tc>, window_params = [{pipeline_mode = #tpu.pipeline_mode<synchronous>, transform_indices = @transform_0, window_bounds = array<i64: 8, 128>}, {transform_indices = @transform_1, window_bounds = array<i64: 8, 1>}, {pipeline_mode = #tpu.pipeline_mode<synchronous>, transform_indices = @transform_2, window_bounds = array<i64: 1, 8>}, {transform_indices = @transform_3, window_bounds = array<i64: 8, 1>}, {pipeline_mode = #tpu.pipeline_mode<synchronous>, transform_indices = @transform_4, window_bounds = array<i64: 1, 8>}, {transform_indices = @transform_5, window_bounds = array<i64: 8, 1>}]} {
    %c8_i32 = arith.constant 8 : i32
    %0 = arith.muli %arg0, %c8_i32 : i32
    %1 = tpu.assume_multiple %0, 8 : i32
    %c0 = arith.constant 0 : index
    %c0_0 = arith.constant 0 : index
    %2 = vector.load %arg1[%c0, %c0_0] : memref<8x128xbf16, #tpu.memory_space<vmem>>, vector<8x128xbf16>
    %3 = arith.index_cast %1 : i32 to index
    %c0_1 = arith.constant 0 : index
    %4 = vector.load %arg1[%3, %c0_1] : memref<8x128xbf16, #tpu.memory_space<vmem>>, vector<8x128xbf16>
    %cst = arith.constant dense<0.000000e+00> : vector<8x8xf32>
    %5 = tpu.matmul %4, %2, %cst {dimension_numbers = #tpu.dot_dimension_numbers<[1], [1], [0], [0], [0, 0, 1, 0], [], []>} : vector<8x128xbf16>, vector<8x128xbf16>, vector<8x8xf32> -> vector<8x8xf32>
    %6 = tpu.iota {dimensions = array<i32: 1>} : vector<8x8xi32>
    %7 = tpu.iota {dimensions = array<i32: 0>} : vector<8x1xi32>
    %8 = vector.broadcast %1 : i32 to vector<8x1xi32>
    %9 = arith.addi %7, %8 : vector<8x1xi32>
    %10 = vector.broadcast %9 : vector<8x1xi32> to vector<8x8xi32>
    %11 = arith.cmpi eq, %6, %10 : vector<8x8xi32>
    %cst_2 = arith.constant 1.000000e+00 : f32
    %12 = vector.broadcast %cst_2 : f32 to vector<8x8xf32>
    %13 = arith.select %11, %12, %5 : vector<8x8xi1>, vector<8x8xf32>
    %cst_3 = arith.constant 1.000000e+00 : f32
    %14 = vector.broadcast %cst_3 : f32 to vector<8x8xf32>
    %15 = arith.subf %14, %13 : vector<8x8xf32>
    %cst_4 = arith.constant 5.000000e-01 : f32
    %16 = vector.broadcast %cst_4 : f32 to vector<8x8xf32>
    %17 = arith.mulf %15, %16 : vector<8x8xf32>
    %cst_5 = arith.constant 0.000000e+00 : f32
    %cst_6 = arith.constant 1.000000e+00 : f32
    %18 = vector.broadcast %cst_5 : f32 to vector<8x8xf32>
    %19 = arith.maximumf %18, %17 : vector<8x8xf32>
    %20 = vector.broadcast %cst_6 : f32 to vector<8x8xf32>
    %21 = arith.minimumf %20, %19 : vector<8x8xf32>
    %22 = math.sqrt %21 : vector<8x8xf32>
    %cst_7 = arith.constant 2.500000e-01 : f32
    %23 = vector.broadcast %cst_7 : f32 to vector<8x8xf32>
    %24 = arith.cmpf ogt, %21, %23 : vector<8x8xf32>
    %cst_8 = arith.constant 1.000000e+00 : f32
    %25 = vector.broadcast %cst_8 : f32 to vector<8x8xf32>
    %26 = arith.subf %25, %22 : vector<8x8xf32>
    %cst_9 = arith.constant 5.000000e-01 : f32
    %27 = vector.broadcast %cst_9 : f32 to vector<8x8xf32>
    %28 = arith.mulf %26, %27 : vector<8x8xf32>
    %29 = arith.select %24, %28, %21 : vector<8x8xi1>, vector<8x8xf32>
    %30 = math.sqrt %29 : vector<8x8xf32>
    %31 = arith.select %24, %30, %22 : vector<8x8xi1>, vector<8x8xf32>
    %cst_10 = arith.constant 4.216320e-02 : f32
    %32 = vector.broadcast %cst_10 : f32 to vector<8x8xf32>
    %33 = arith.mulf %32, %29 : vector<8x8xf32>
    %cst_11 = arith.constant 0.024181312 : f32
    %34 = vector.broadcast %cst_11 : f32 to vector<8x8xf32>
    %35 = arith.addf %33, %34 : vector<8x8xf32>
    %36 = arith.mulf %35, %29 : vector<8x8xf32>
    %cst_12 = arith.constant 0.0454700254 : f32
    %37 = vector.broadcast %cst_12 : f32 to vector<8x8xf32>
    %38 = arith.addf %36, %37 : vector<8x8xf32>
    %39 = arith.mulf %38, %29 : vector<8x8xf32>
    %cst_13 = arith.constant 0.0749530047 : f32
    %40 = vector.broadcast %cst_13 : f32 to vector<8x8xf32>
    %41 = arith.addf %39, %40 : vector<8x8xf32>
    %42 = arith.mulf %41, %29 : vector<8x8xf32>
    %cst_14 = arith.constant 0.166667521 : f32
    %43 = vector.broadcast %cst_14 : f32 to vector<8x8xf32>
    %44 = arith.addf %42, %43 : vector<8x8xf32>
    %45 = arith.mulf %44, %29 : vector<8x8xf32>
    %46 = arith.mulf %45, %31 : vector<8x8xf32>
    %47 = arith.addf %46, %31 : vector<8x8xf32>
    %cst_15 = arith.constant 2.000000e+00 : f32
    %48 = vector.broadcast %cst_15 : f32 to vector<8x8xf32>
    %49 = arith.mulf %48, %47 : vector<8x8xf32>
    %cst_16 = arith.constant 1.57079637 : f32
    %50 = vector.broadcast %cst_16 : f32 to vector<8x8xf32>
    %51 = arith.subf %50, %49 : vector<8x8xf32>
    %52 = arith.select %24, %51, %47 : vector<8x8xi1>, vector<8x8xf32>
    %cst_17 = arith.constant -6.000000e+01 : f32
    %53 = vector.broadcast %cst_17 : f32 to vector<8x8xf32>
    %54 = arith.mulf %53, %52 : vector<8x8xf32>
    %c0_18 = arith.constant 0 : index
    %c0_19 = arith.constant 0 : index
    %55 = vector.load %arg2[%c0_18, %c0_19] : memref<8x1xi32, #tpu.memory_space<vmem>>, vector<8x1xi32>
    %c0_20 = arith.constant 0 : index
    %c0_21 = arith.constant 0 : index
    %56 = vector.load %arg3[%c0_20, %c0_21] : memref<1x8xi32, #tpu.memory_space<vmem>>, vector<1x8xi32>
    %57 = vector.broadcast %55 : vector<8x1xi32> to vector<8x8xi32>
    %58 = vector.broadcast %56 : vector<1x8xi32> to vector<8x8xi32>
    %59 = arith.cmpi eq, %57, %58 : vector<8x8xi32>
    %c0_22 = arith.constant 0 : index
    %c0_23 = arith.constant 0 : index
    %60 = vector.load %arg4[%c0_22, %c0_23] : memref<8x1xf32, #tpu.memory_space<vmem>>, vector<8x1xf32>
    %c0_24 = arith.constant 0 : index
    %c0_25 = arith.constant 0 : index
    %61 = vector.load %arg5[%c0_24, %c0_25] : memref<1x8xf32, #tpu.memory_space<vmem>>, vector<1x8xf32>
    %62 = vector.broadcast %60 : vector<8x1xf32> to vector<8x8xf32>
    %63 = vector.broadcast %61 : vector<1x8xf32> to vector<8x8xf32>
    %64 = arith.addf %62, %63 : vector<8x8xf32>
    %65 = arith.addf %54, %64 : vector<8x8xf32>
    %cst_26 = arith.constant 0.000000e+00 : f32
    %66 = vector.broadcast %cst_26 : f32 to vector<8x8xf32>
    %67 = arith.subf %66, %65 : vector<8x8xf32>
    %cst_27 = arith.constant dense<true> : vector<8x8xi1>
    %68 = arith.xori %59, %cst_27 : vector<8x8xi1>
    %cst_28 = arith.constant -3.000000e+02 : f32
    %69 = vector.broadcast %cst_28 : f32 to vector<8x8xf32>
    %70 = arith.select %59, %67, %69 : vector<8x8xi1>, vector<8x8xf32>
    %71 = arith.subf %54, %64 : vector<8x8xf32>
    %cst_29 = arith.constant -3.000000e+02 : f32
    %72 = vector.broadcast %cst_29 : f32 to vector<8x8xf32>
    %73 = arith.select %68, %71, %72 : vector<8x8xi1>, vector<8x8xf32>
    %cst_30 = arith.constant dense<0xFF800000> : vector<8xf32>
    %74 = vector.multi_reduction <maximumf>, %70, %cst_30 [1] : vector<8x8xf32> to vector<8xf32>
    %75 = vector.shape_cast %74 : vector<8xf32> to vector<8x1xf32>
    %76 = vector.broadcast %75 : vector<8x1xf32> to vector<8x8xf32>
    %77 = arith.subf %70, %76 : vector<8x8xf32>
    %78 = math.exp %77 : vector<8x8xf32>
    %cst_31 = arith.constant dense<0.000000e+00> : vector<8xf32>
    %79 = vector.multi_reduction <add>, %78, %cst_31 [1] : vector<8x8xf32> to vector<8xf32>
    %80 = vector.shape_cast %79 : vector<8xf32> to vector<8x1xf32>
    %81 = math.log %80 : vector<8x1xf32>
    %82 = arith.addf %81, %75 : vector<8x1xf32>
    %cst_32 = arith.constant dense<0xFF800000> : vector<8xf32>
    %83 = vector.multi_reduction <maximumf>, %73, %cst_32 [1] : vector<8x8xf32> to vector<8xf32>
    %84 = vector.shape_cast %83 : vector<8xf32> to vector<8x1xf32>
    %85 = vector.broadcast %84 : vector<8x1xf32> to vector<8x8xf32>
    %86 = arith.subf %73, %85 : vector<8x8xf32>
    %87 = math.exp %86 : vector<8x8xf32>
    %cst_33 = arith.constant dense<0.000000e+00> : vector<8xf32>
    %88 = vector.multi_reduction <add>, %87, %cst_33 [1] : vector<8x8xf32> to vector<8xf32>
    %89 = vector.shape_cast %88 : vector<8xf32> to vector<8x1xf32>
    %90 = math.log %89 : vector<8x1xf32>
    %91 = arith.addf %90, %84 : vector<8x1xf32>
    %92 = arith.addf %82, %91 : vector<8x1xf32>
    %cst_34 = arith.constant 0.000000e+00 : f32
    %93 = vector.broadcast %cst_34 : f32 to vector<8x1xf32>
    %94 = arith.cmpf ogt, %92, %93 : vector<8x1xf32>
    %cst_35 = arith.constant 0.000000e+00 : f32
    %95 = vector.broadcast %cst_35 : f32 to vector<8x1xf32>
    %96 = arith.subf %95, %92 : vector<8x1xf32>
    %97 = math.exp %96 : vector<8x1xf32>
    %98 = math.log1p %97 : vector<8x1xf32>
    %99 = arith.addf %92, %98 : vector<8x1xf32>
    %100 = math.exp %92 : vector<8x1xf32>
    %101 = math.log1p %100 : vector<8x1xf32>
    %102 = arith.select %94, %99, %101 : vector<8x1xi1>, vector<8x1xf32>
    %c0_36 = arith.constant 0 : index
    %c0_37 = arith.constant 0 : index
    %103 = vector.load %arg6[%c0_36, %c0_37] : memref<8x1xf32, #tpu.memory_space<vmem>>, vector<8x1xf32>
    tpu.vector_store %arg6[%c0_36, %c0_37], %102 {strides = array<i32>} : memref<8x1xf32, #tpu.memory_space<vmem>>, vector<8x1xf32>,
    return
  }
  func.func @transform_0(%arg0: i32) -> (i32, i32) {
    %c0_i32 = arith.constant 0 : i32
    %c0_i32_0 = arith.constant 0 : i32
    %c0_i32_1 = arith.constant 0 : i32
    return %c0_i32, %c0_i32_0 : i32, i32
  }
  func.func @transform_1(%arg0: i32) -> (i32, i32) {
    %c0_i32 = arith.constant 0 : i32
    %c0_i32_0 = arith.constant 0 : i32
    return %arg0, %c0_i32 : i32, i32
  }
  func.func @transform_2(%arg0: i32) -> (i32, i32) {
    %c0_i32 = arith.constant 0 : i32
    %c0_i32_0 = arith.constant 0 : i32
    %c0_i32_1 = arith.constant 0 : i32
    return %c0_i32, %c0_i32_0 : i32, i32
  }
  func.func @transform_3(%arg0: i32) -> (i32, i32) {
    %c0_i32 = arith.constant 0 : i32
    %c0_i32_0 = arith.constant 0 : i32
    return %arg0, %c0_i32 : i32, i32
  }
  func.func @transform_4(%arg0: i32) -> (i32, i32) {
    %c0_i32 = arith.constant 0 : i32
    %c0_i32_0 = arith.constant 0 : i32
    %c0_i32_1 = arith.constant 0 : i32
    return %c0_i32, %c0_i32_0 : i32, i32
  }
  func.func @transform_5(%arg0: i32) -> (i32, i32) {
    %c0_i32 = arith.constant 0 : i32
    %c0_i32_0 = arith.constant 0 : i32
    return %arg0, %c0_i32 : i32, i32
  }
}

</mosaic_0001>

<bundles_post_ra>
// kernel: tpu_custom_call.1
= control target key start
LH: loop header
LB: loop body
LE: loop exit
PB: predicated region body
PF: predicated region fallthrough
CT: control target
= control target key end

     0   :  { %v239_v0 = vmov 0.0   ;;  %vm240_vm0 = vmmov 0   ;;  %v241_v3 = vmov 0   ;;  %v68_v6 = vlaneseq  ;;  %s301_s0 = inlined_call_operand.vmem [shape: bf16[8,128], index: 0, kind: input, shape index: {}]   ;;  %s302_s3 = inlined_call_operand.vmem [shape: f32[8,1], index: 3, kind: input, shape index: {}]   ;;  %s303_s1 = inlined_call_operand.vmem [shape: s32[8,1], index: 1, kind: input, shape index: {}]   ;;  %s304_s4 = inlined_call_operand.vmem [shape: f32[1,8], index: 4, kind: input, shape index: {}]   ;;  %s305_s2 = inlined_call_operand.vmem [shape: s32[1,8], index: 2, kind: input, shape index: {}]   ;;  %s306_s5 = inlined_call_operand.vmem [shape: f32[8,1], index: 5, kind: output, shape index: {}]  }
   0x1   :  { %208 = vmatprep.subr.bf16.mxu0 %v239_v0  ;;  %v22_v1 = vld [vmem:[%s301_s0] sm:$0xf]  ;;  %210 = vmatprep.mubr.msk.bf16.mxu0 %vm240_vm0, %v239_v0  ;;  %vm144_vm8 = vcmask 64512   ;;  %vm242_vm9 = vmmov 1   ;;  %vm196_vm12 = vcmask 7168  }
   0x2   :  { %v124_v2 = vld [vmem:[%s302_s3] sm:$0xff]  ;;  %209 = vmatpush3.bf16.xpose.msra.mxu0 %v22_v1  ;;  %218 = vset.pattern.permute.xlu0 %v241_v3  ;;  %v69_v7 = vand.u32 127, %v68_v6  ;;  %v71_v8 = vshrl.u32 %v68_v6, 7 }
   0x3   :  { %128 = vperm.xlu0 %218, %v124_v2   ;;  %v114_v4 = vld [vmem:[%s303_s1] sm:$0xff] }
   0x4   :  { %v27_v5 = vld [vmem:[%s301_s0] sm:$0xf]  ;;  %vm74_vm1 = vcmp.eq.s32.totalorder %v69_v7, %v71_v8 }
   0x5   :  { %v205_v43 = vld [vmem:[%s304_s4] ss:$0 sm:$0xff] }
   0x6   :  { %v204_v50 = vld [vmem:[%s305_s2] ss:$0 sm:$0xff] }
   0x7   :  { %117 = vperm.xlu0 %218, %v114_v4  }
   0x9   :  { %211 = vmatmul.mubr.bf16.vlgmr.msra.gmra.mrb[0].mxu0 %v27_v5 }
  0x82   :  { %v129_v44 = vpop.permute.xlu0 %128 }
  0x83   :  { %v137_v47 = vadd.f32 %v205_v43, %v129_v44 }
  0x86   :  { %v118_v51 = vpop.permute.xlu0 %117 }
  0x87   :  { %vm123_vm7 = vcmp.eq.s32.totalorder %v118_v51, %v204_v50 }
  0x88   :  { %vm140_vm10 = vmxor %vm123_vm7, %vm242_vm9 }
  0xdc   :  { %v62_v9 = vpop.f32.mrb[0].mxu0 }
  0xdd   :  { %v75_v10 = vsel %vm74_vm1, 1.0, %v62_v9  ;;  %v212_v11 = vpop.f32.mrb[1].mxu0 }
  0xde   :  { %v76_v12 = vsub.f32 1.0, %v75_v10  ;;  %v65_v13 = vpop.f32.mrb[2].mxu0 }
  0xdf   :  { %v213_v14 = vpop.f32.mrb[3].mxu0 }
  0xe0   :  { %v77_v15 = vmul.f32 0.5, %v76_v12 }
  0xe2   :  { %v78_v16 = vmax.f32 %v77_v15, 0.0 }
  0xe4   :  { %v79_v17 = vmin.f32 %v78_v16, 1.0 }
  0xe6   :  { %219 = vrsqrt.f32 %v79_v17  ;;  %vm82_vm2 = vcmp.eq.f32.partialorder %v79_v17, inf  ;;  %v85_v20 = vand.u32 2147483648, %v79_v17  ;;  %vm84_vm3 = vcmp.eq.f32.partialorder %v79_v17, 0.0 }
  0xe7   :  { %vm87_vm4 = vcmp.gt.f32.partialorder %v79_v17, 0.25 }
  0xf0   :  { %v220_v18 = vpop.eup %219 }
  0xf1   :  { %v81_v19 = vmul.f32 %v220_v18, %v79_v17 }
  0xf3   :  { %v83_v21 = vsel %vm82_vm2, %v79_v17, %v81_v19 }
  0xf4   :  { %v86_v22 = vsel %vm84_vm3, %v85_v20, %v83_v21 }
  0xf5   :  { %v88_v23 = vsub.f32 1.0, %v86_v22 }
  0xf7   :  { %v89_v24 = vmul.f32 0.5, %v88_v23 }
  0xf9   :  { %v90_v25 = vsel %vm87_vm4, %v89_v24, %v79_v17 }
  0xfa   :  { %221 = vrsqrt.f32 %v90_v25  ;;  %v99_v26 = vmul.f32 0.0421632, %v90_v25  ;;  %vm93_vm5 = vcmp.eq.f32.partialorder %v90_v25, inf  ;;  %v96_v35 = vand.u32 2147483648, %v90_v25 }
  0xfb   :  { %vm95_vm6 = vcmp.eq.f32.partialorder %v90_v25, 0.0 }
  0xfc   :  { %v100_v27 = vadd.f32 0.024181312, %v99_v26 }
  0xfe   :  { %v101_v28 = vmul.f32 %v100_v27, %v90_v25 }
 0x100   :  { %v102_v29 = vadd.f32 0.045470025, %v101_v28 }
 0x102   :  { %v103_v30 = vmul.f32 %v102_v29, %v90_v25 }
 0x104   :  { %v222_v31 = vpop.eup %221  ;;  %v104_v33 = vadd.f32 0.074953005, %v103_v30 }
 0x105   :  { %v92_v32 = vmul.f32 %v222_v31, %v90_v25 }
 0x106   :  { %v105_v36 = vmul.f32 %v104_v33, %v90_v25 }
 0x107   :  { %v94_v34 = vsel %vm93_vm5, %v90_v25, %v92_v32 }
 0x108   :  { %v97_v37 = vsel %vm95_vm6, %v96_v35, %v94_v34  ;;  %v106_v38 = vadd.f32 0.16666752, %v105_v36 }
 0x109   :  { %v98_v40 = vsel %vm87_vm4, %v97_v37, %v86_v22 }
 0x10a   :  { %v107_v39 = vmul.f32 %v106_v38, %v90_v25 }
 0x10c   :  { %v108_v41 = vmul.f32 %v107_v39, %v98_v40 }
 0x10e   :  { %v109_v42 = vadd.f32 %v108_v41, %v98_v40 }
 0x110   :  { %v110_v45 = vmul.f32 2.0, %v109_v42 }
 0x112   :  { %v111_v46 = vsub.f32 1.5707964, %v110_v45 }
 0x114   :  { %v112_v48 = vsel %vm87_vm4, %v111_v46, %v109_v42 }
 0x115   :  { %v113_v49 = vmul.f32 -60.0, %v112_v48 }
 0x117   :  { %v138_v52 = vadd.f32 %v137_v47, %v113_v49  ;;  %v142_v53 = vsub.f32 %v113_v49, %v137_v47 }
 0x119   :  { %v139_v54 = vsub.f32 0.0, %v138_v52  ;;  %v143_v57 = vsel %vm140_vm10, %v142_v53, -300.0 }
 0x11a   :  { %v157_v58 = vsel %vm144_vm8, %v143_v57, -inf }
 0x11b   :  { %v141_v55 = vsel %vm123_vm7, %v139_v54, -300.0 }
 0x11c   :  { %v145_v56 = vsel %vm144_vm8, %v141_v55, -inf }
 0x11d   :  { %146 = vmax.xlane.f32.xlu1 %v145_v56 }
 0x121   :  { %158 = vmax.xlane.f32.xlu1 %v157_v58 }
 0x1aa   :  { %v147_v59 = vpop.xlane.xlu1 %146 }
 0x1ab   :  { %v148_v60 = vsub.f32 %v141_v55, %v147_v59 }
 0x1ad   :  { %v149_v61 = vmul.f32 1.442695, %v148_v60 }
 0x1ae   :  { %v159_v62 = vpop.xlane.xlu1 %158 }
 0x1af   :  { %223 = vpow2.f32 %v149_v61  ;;  %v160_v63 = vsub.f32 %v143_v57, %v159_v62 }
 0x1b1   :  { %v161_v0 = vmul.f32 1.442695, %v160_v63 }
 0x1b3   :  { %225 = vpow2.f32 %v161_v0 }
 0x1b9   :  { %v224_v1 = vpop.eup %223 }
 0x1ba   :  { %v151_v2 = vsel %vm144_vm8, %v224_v1, 0.0 }
 0x1bb   :  { %152 = vadd.xlane.f32.xlu0 %v151_v2 }
 0x1bd   :  { %v226_v3 = vpop.eup %225 }
 0x1be   :  { %v163_v4 = vsel %vm144_vm8, %v226_v3, 0.0 }
 0x1bf   :  { %164 = vadd.xlane.f32.xlu1 %v163_v4 }
 0x248   :  { %v153_v5 = vpop.xlane.xlu0 %152 }
 0x249   :  { %227 = vlog2.f32 %v153_v5 }
 0x24c   :  { %v165_v6 = vpop.xlane.xlu1 %164 }
 0x24d   :  { %229 = vlog2.f32 %v165_v6 }
 0x253   :  { %v228_v7 = vpop.eup %227 }
 0x254   :  { %v155_v8 = vmul.f32 0.6931472, %v228_v7 }
 0x256   :  { %v156_v11 = vadd.f32 %v155_v8, %v147_v59 }
 0x257   :  { %v230_v9 = vpop.eup %229 }
 0x258   :  { %v167_v10 = vmul.f32 0.6931472, %v230_v9 }
 0x25a   :  { %v168_v12 = vadd.f32 %v167_v10, %v159_v62 }
 0x25c   :  { %v169_v13 = vadd.f32 %v168_v12, %v156_v11 }
 0x25e   :  { %v171_v14 = vsub.f32 0.0, %v169_v13  ;;  %v184_v15 = vmul.f32 1.442695, %v169_v13  ;;  %vm170_vm14 = vcmp.gt.f32.partialorder %v169_v13, 0.0 }
 0x260   :  { %v172_v16 = vmul.f32 1.442695, %v171_v14  ;;  %231 = vpow2.f32 %v184_v15 }
 0x262   :  { %233 = vpow2.f32 %v172_v16 }
 0x26a   :  { %v232_v17 = vpop.eup %231 }
 0x26b   :  { %v186_v18 = vadd.f32 1.0, %v232_v17  ;;  %v189_v22 = vmul.f32 -0.5, %v232_v17  ;;  %v192_v28 = vand.u32 2147483647, %v232_v17 }
 0x26c   :  { %v234_v19 = vpop.eup %233 }
 0x26d   :  { %v174_v20 = vadd.f32 1.0, %v234_v19  ;;  %235 = vlog2.f32 %v186_v18  ;;  %v177_v21 = vmul.f32 -0.5, %v234_v19  ;;  %v180_v25 = vand.u32 2147483647, %v234_v19 }
 0x26e   :  { %v190_v26 = vadd.f32 1.0, %v189_v22  ;;  %vm193_vm13 = vcmp.lt.f32.partialorder %v192_v28, 0.0004427343 }
 0x26f   :  { %237 = vlog2.f32 %v174_v20  ;;  %v178_v23 = vadd.f32 1.0, %v177_v21  ;;  %vm181_vm11 = vcmp.lt.f32.partialorder %v180_v25, 0.0004427343 }
 0x270   :  { %v191_v33 = vmul.f32 %v232_v17, %v190_v26 }
 0x271   :  { %v179_v30 = vmul.f32 %v234_v19, %v178_v23 }
 0x277   :  { %v236_v24 = vpop.eup %235 }
 0x278   :  { %v188_v31 = vmul.f32 0.6931472, %v236_v24 }
 0x279   :  { %v238_v27 = vpop.eup %237 }
 0x27a   :  { %v176_v29 = vmul.f32 0.6931472, %v238_v27  ;;  %v194_v35 = vsel %vm193_vm13, %v191_v33, %v188_v31 }
 0x27c   :  { %v182_v32 = vsel %vm181_vm11, %v179_v30, %v176_v29 }
 0x27d   :  { %v183_v34 = vadd.f32 %v182_v32, %v169_v13 }
 0x27f   :  { %v195_v36 = vsel %vm170_vm14, %v183_v34, %v194_v35 }
 0x280   :  { %197 = vst.msk [vmem:[%s306_s5] sm:$0xff] %vm196_vm12, %v195_v36 }

</bundles_post_ra>
